<compile_context>
chip_gen: v7x
topology: tpu7x:2x2x1
jax: 0.10.0
libtpu: 0.0.40
codegen_flags: <defaults>
</compile_context>

<pallas_src>
import functools

import jax
import jax.numpy as jnp
from jax.experimental import pallas as pl
from jax.experimental.pallas import tpu as pltpu

# Hyper-parameters from the module's __init__ defaults.  The pow-free focusing
# weight below hardcodes the integer gammas (pos: ^1, neg: ^4) and requires
# strictly binary targets y in {0, 1}.
GAMMA_NEG = 4.0
GAMMA_POS = 1.0
CLIP = 0.05
EPS = 1e-08
# disable_torch_grad_focal_loss only affects autograd, not forward values.


def _round_up(v, m):
    return (v + m - 1) // m * m


def _asl_kernel(x_ref, y_ref, out_ref, loss_acc, y_acc, *,
                row_tiles_per_shard, batch, classes,
                need_row_mask, need_col_mask):
    p = pl.program_id(0)      # row-tile shard ("parallel": one per TC on v7x)
    r = pl.program_id(1)      # row tile within shard
    c = pl.program_id(2)      # class tile

    @pl.when((r == 0) & (c == 0))
    def _init():
        loss_acc[...] = jnp.zeros_like(loss_acc)
        y_acc[...] = jnp.zeros_like(y_acc)

    tile_rows, tile_cols = x_ref.shape
    x = x_ref[...].astype(jnp.float32)
    y = y_ref[...].astype(jnp.float32)
    pos = y > 0.0  # binary-target contract

    # sigmoid(x) = 0.5 * (1 + tanh(x/2)): a single EUP transcendental.
    xs_pos = 0.5 * (jnp.tanh(0.5 * x) + 1.0)
    xs_neg = jnp.minimum((1.0 - xs_pos) + CLIP, 1.0)

    # Fused  y*log(max(xs_pos,eps)) + (1-y)*log(max(xs_neg,eps))  (binary y).
    logp = jnp.log(jnp.maximum(jnp.where(pos, xs_pos, xs_neg), EPS))

    # Asymmetric focusing weight with integer gammas — no jnp.power:
    #   positives: (1 - xs_pos)^1    negatives: (1 - xs_neg)^4
    t = 1.0 - xs_neg
    t2 = t * t
    w = jnp.where(pos, 1.0 - xs_pos, t2 * t2)
    contrib = logp * w

    # Ragged row/col tiles handled by in-kernel masking (no wrapper jnp.pad).
    if need_row_mask or need_col_mask:
        ok = None
        if need_row_mask:
            row0 = (p * row_tiles_per_shard + r) * tile_rows
            rows = jax.lax.broadcasted_iota(jnp.int32, (tile_rows, tile_cols), 0)
            ok = rows + row0 < batch
        if need_col_mask:
            cols = jax.lax.broadcasted_iota(jnp.int32, (tile_rows, tile_cols), 1)
            cm = cols + c * tile_cols < classes
            ok = cm if ok is None else ok & cm
        contrib = jnp.where(ok, contrib, 0.0)
        y = jnp.where(ok, y, 0.0)

    # Row-folded accumulation: sublane-aligned VALU adds into (8, tile_cols).
    folds = tile_rows // 8
    loss_acc[...] += contrib.reshape(folds, 8, tile_cols).sum(axis=0)
    y_acc[...] += y.reshape(folds, 8, tile_cols).sum(axis=0)

    # Per-shard finalize: single cross-lane reduce, write this shard's partials.
    @pl.when((r == pl.num_programs(1) - 1) & (c == pl.num_programs(2) - 1))
    def _finalize():
        num_part = jnp.sum(loss_acc[...])
        y_part = jnp.sum(y_acc[...])
        lane = jax.lax.broadcasted_iota(jnp.int32, (8, 128), 1)
        blk = jnp.where(lane == 0, num_part, jnp.where(lane == 1, y_part, 0.0))
        out_ref[...] = blk.reshape(1, 8, 128)


def _default_vmem_limit_bytes():
    cap = None
    try:
        cap = pltpu.get_tpu_info().vmem_capacity_bytes
    except Exception:
        cap = None
    if not cap:
        cap = 64 * 1024 * 1024  # assume the smallest generation (v7x-like)
    # Use up to half of physical VMEM, between 32 MiB (v7x) and 64 MiB (v5e/v6e).
    return int(min(64 * 1024 * 1024, max(32 * 1024 * 1024, cap // 2)))


def _choose_tiling(batch, classes, x_bytes, y_bytes, budget, tile_rows, tile_cols):
    # Per tile element: double-buffered inputs + ~8 live f32 temporaries.
    per_elem = 2 * (x_bytes + y_bytes) + 32

    if tile_cols is None:
        if 8 * classes * per_elem + 2 * 8 * classes * 4 <= budget:
            tile_cols = classes  # full-C, lane-dense blocks
        else:
            # Extreme multi-label: tile the class dim in 128-lane multiples.
            tc = budget // (8 * per_elem + 64)
            tile_cols = max(128, int(tc) // 128 * 128)
    else:
        assert tile_cols == classes or tile_cols % 128 == 0

    if tile_rows is None:
        avail = budget - 2 * 8 * tile_cols * 4  # minus the (8, C) accumulators
        rows = avail // (tile_cols * per_elem)
        rows = min(int(rows), 4096, _round_up(batch, 8))
        tile_rows = max(8, rows // 8 * 8)
    else:
        assert tile_rows % 8 == 0
    return tile_rows, tile_cols


def asymmetric_loss_optimized(x, y, *, tile_rows=None, tile_cols=None, num_shards=2):
    """x: (B, C) logits, y: (B, C) binary {0,1} targets. Returns scalar float32.

    Narrow dtypes (bf16 logits, int8/float targets) are consumed directly and
    cast to f32 inside the kernel — do NOT pre-cast in the caller (that adds a
    separate un-fused HBM pass).  Targets must be binary; soft labels are
    outside the contract of the pow-free focusing weight.
    """
    assert x.shape == y.shape and x.ndim == 2
    B, C = x.shape

    vmem_limit = _default_vmem_limit_bytes()
    budget = vmem_limit - 8 * 1024 * 1024  # headroom for output bufs / internal scratch
    tile_rows, tile_cols = _choose_tiling(
        B, C, x.dtype.itemsize, y.dtype.itemsize, budget, tile_rows, tile_cols)

    n_row_tiles = -(-B // tile_rows)
    n_col_tiles = -(-C // tile_cols)
    num_shards = num_shards if n_row_tiles > 1 else 1
    rpp = -(-n_row_tiles // num_shards)  # row tiles per shard

    need_row_mask = num_shards * rpp * tile_rows > B
    need_col_mask = n_col_tiles * tile_cols > C

    def in_map(p, r, c):
        # Clamp: shards whose logical tile runs past the last real tile re-read
        # the last valid tile; the in-kernel row mask zeroes their contribution.
        return (jnp.minimum(p * rpp + r, n_row_tiles - 1), c)

    kernel = functools.partial(
        _asl_kernel,
        row_tiles_per_shard=rpp, batch=B, classes=C,
        need_row_mask=need_row_mask, need_col_mask=need_col_mask)

    partials = pl.pallas_call(
        kernel,
        out_shape=jax.ShapeDtypeStruct((num_shards, 8, 128), jnp.float32),
        grid=(num_shards, rpp, n_col_tiles),
        in_specs=[
            pl.BlockSpec((tile_rows, tile_cols), in_map),
            pl.BlockSpec((tile_rows, tile_cols), in_map),
        ],
        out_specs=pl.BlockSpec((1, 8, 128), lambda p, r, c: (p, 0, 0)),
        scratch_shapes=[
            pltpu.VMEM((8, tile_cols), jnp.float32),  # row-folded sum(loss * w)
            pltpu.VMEM((8, tile_cols), jnp.float32),  # row-folded sum(y)
        ],
        compiler_params=pltpu.CompilerParams(
            dimension_semantics=("parallel", "arbitrary", "arbitrary"),
            vmem_limit_bytes=vmem_limit,
        ),
        # TODO(synk): if xprof on v7x shows exposed DMA at block boundaries,
        # add pipeline_mode=pl.Buffered(3) on the two input BlockSpecs.
    )(x, y)

    numerator = jnp.sum(partials[:, 0, 0])
    sum_y = jnp.sum(partials[:, 0, 1])
    # (xs_neg <= 1) is always true after the clamp -> constant B*C term.
    unit_count = sum_y + jnp.float32(B * C)
    return -numerator / unit_count


def _reference(x, y):
    """Pure-JAX replica of the original PyTorch forward (for verification)."""
    x = x.astype(jnp.float32)
    y = y.astype(jnp.float32)
    anti = 1.0 - y
    xs_pos = jax.nn.sigmoid(x)
    xs_neg = jnp.minimum(1.0 - xs_pos + CLIP, 1.0)
    unit_count = jnp.sum(y) + jnp.sum((xs_neg <= 1.0).astype(jnp.float32))
    loss = y * jnp.log(jnp.maximum(xs_pos, EPS))
    loss = loss + anti * jnp.log(jnp.maximum(xs_neg, EPS))
    w = jnp.power(1.0 - xs_pos * y - xs_neg * anti,
                  GAMMA_POS * y + GAMMA_NEG * anti)
    return -jnp.sum(loss * w) / unit_count


if __name__ == "__main__":
    key = jax.random.PRNGKey(0)
    k1, k2, k3, k4 = jax.random.split(key, 4)

    # 1) f32/f32, ragged batch, forced multi-tile grid: exercises the row mask,
    #    two row-tile shards, and per-shard accumulator re-init / partials.
    B, C = 30, 128
    x1 = jax.random.normal(k1, (B, C), dtype=jnp.float32) * 2.0
    y1 = (jax.random.uniform(k2, (B, C)) < 0.3).astype(jnp.float32)
    out1 = jax.block_until_ready(asymmetric_loss_optimized(x1, y1, tile_rows=8))
    ref1 = _reference(x1, y1)
    assert jnp.allclose(out1, ref1, rtol=2e-4, atol=1e-6), (out1, ref1)

    # 2) class-dim tiling + ragged class tile (col mask) + ragged batch.
    B2, C2 = 12, 200
    x2 = jax.random.normal(k3, (B2, C2), dtype=jnp.float32) * 2.0
    y2 = (jax.random.uniform(k4, (B2, C2)) < 0.3).astype(jnp.float32)
    out2 = jax.block_until_ready(
        asymmetric_loss_optimized(x2, y2, tile_rows=8, tile_cols=128))
    ref2 = _reference(x2, y2)
    assert jnp.allclose(out2, ref2, rtol=2e-4, atol=1e-6), (out2, ref2)

    # 3) narrow dtypes straight into the kernel (bf16 logits, int8 targets).
    B3, C3 = 40, 128
    x3 = (jax.random.normal(k1, (B3, C3), dtype=jnp.float32) * 2.0).astype(jnp.bfloat16)
    y3 = (jax.random.uniform(k2, (B3, C3)) < 0.3).astype(jnp.int8)
    out3 = jax.block_until_ready(asymmetric_loss_optimized(x3, y3, tile_rows=32))
    ref3 = _reference(x3, y3)
    assert jnp.allclose(out3, ref3, rtol=2e-4, atol=1e-6), (out3, ref3)

    print("KERNEL_OK")
</pallas_src>

<mosaic_0001>
module attributes {stable_mosaic.version = 11 : i64} {
  func.func @_asl_kernel(%arg0: i32, %arg1: i32, %arg2: i32, %arg3: memref<8x128xf32, #tpu.memory_space<vmem>>, %arg4: memref<8x128xf32, #tpu.memory_space<vmem>>, %arg5: memref<1x8x128xf32, #tpu.memory_space<vmem>>, %arg6: memref<8x128xf32, #tpu.memory_space<vmem>>, %arg7: memref<8x128xf32, #tpu.memory_space<vmem>>) attributes {dimension_semantics = [#tpu.dimension_semantics<parallel>, #tpu.dimension_semantics<arbitrary>, #tpu.dimension_semantics<arbitrary>], iteration_bounds = array<i64: 2, 2, 1>, scalar_prefetch = 0 : i64, scratch_operands = 2 : i64, tpu.core_type = #tpu.core_type<tc>, window_params = [{transform_indices = @transform_0, window_bounds = array<i64: 8, 128>}, {transform_indices = @transform_1, window_bounds = array<i64: 8, 128>}, {transform_indices = @transform_2, window_bounds = array<i64: 1, 8, 128>}]} {
    %c0_i32 = arith.constant 0 : i32
    %0 = arith.cmpi eq, %arg1, %c0_i32 : i32
    %c0_i32_0 = arith.constant 0 : i32
    %1 = arith.cmpi eq, %arg2, %c0_i32_0 : i32
    %2 = arith.andi %0, %1 : i1
    %3 = arith.extui %2 : i1 to i32
    %c0_i32_1 = arith.constant 0 : i32
    %4 = arith.cmpi ne, %3, %c0_i32_1 : i32
    scf.if %4 {
      %cst_28 = arith.constant 0.000000e+00 : f32
      %61 = vector.broadcast %cst_28 : f32 to vector<8x128xf32>
      %c0_29 = arith.constant 0 : index
      %c0_30 = arith.constant 0 : index
      %62 = vector.load %arg6[%c0_29, %c0_30] : memref<8x128xf32, #tpu.memory_space<vmem>>, vector<8x128xf32>
      tpu.vector_store %arg6[%c0_29, %c0_30], %61 {strides = array<i32>} : memref<8x128xf32, #tpu.memory_space<vmem>>, vector<8x128xf32>,
      %cst_31 = arith.constant 0.000000e+00 : f32
      %63 = vector.broadcast %cst_31 : f32 to vector<8x128xf32>
      %c0_32 = arith.constant 0 : index
      %c0_33 = arith.constant 0 : index
      %64 = vector.load %arg7[%c0_32, %c0_33] : memref<8x128xf32, #tpu.memory_space<vmem>>, vector<8x128xf32>
      tpu.vector_store %arg7[%c0_32, %c0_33], %63 {strides = array<i32>} : memref<8x128xf32, #tpu.memory_space<vmem>>, vector<8x128xf32>,
    } else {
    }
    %c0 = arith.constant 0 : index
    %c0_2 = arith.constant 0 : index
    %5 = vector.load %arg3[%c0, %c0_2] : memref<8x128xf32, #tpu.memory_space<vmem>>, vector<8x128xf32>
    %c0_3 = arith.constant 0 : index
    %c0_4 = arith.constant 0 : index
    %6 = vector.load %arg4[%c0_3, %c0_4] : memref<8x128xf32, #tpu.memory_space<vmem>>, vector<8x128xf32>
    %cst = arith.constant 0.000000e+00 : f32
    %7 = vector.broadcast %cst : f32 to vector<8x128xf32>
    %8 = arith.cmpf ogt, %6, %7 : vector<8x128xf32>
    %cst_5 = arith.constant 5.000000e-01 : f32
    %9 = vector.broadcast %cst_5 : f32 to vector<8x128xf32>
    %10 = arith.mulf %9, %5 : vector<8x128xf32>
    %11 = math.tanh %10 : vector<8x128xf32>
    %cst_6 = arith.constant 1.000000e+00 : f32
    %12 = vector.broadcast %cst_6 : f32 to vector<8x128xf32>
    %13 = arith.addf %11, %12 : vector<8x128xf32>
    %cst_7 = arith.constant 5.000000e-01 : f32
    %14 = vector.broadcast %cst_7 : f32 to vector<8x128xf32>
    %15 = arith.mulf %14, %13 : vector<8x128xf32>
    %cst_8 = arith.constant 1.000000e+00 : f32
    %16 = vector.broadcast %cst_8 : f32 to vector<8x128xf32>
    %17 = arith.subf %16, %15 : vector<8x128xf32>
    %cst_9 = arith.constant 5.000000e-02 : f32
    %18 = vector.broadcast %cst_9 : f32 to vector<8x128xf32>
    %19 = arith.addf %17, %18 : vector<8x128xf32>
    %cst_10 = arith.constant 1.000000e+00 : f32
    %20 = vector.broadcast %cst_10 : f32 to vector<8x128xf32>
    %21 = arith.minimumf %19, %20 : vector<8x128xf32>
    %22 = arith.select %8, %15, %21 : vector<8x128xi1>, vector<8x128xf32>
    %cst_11 = arith.constant 9.99999993E-9 : f32
    %23 = vector.broadcast %cst_11 : f32 to vector<8x128xf32>
    %24 = arith.maximumf %22, %23 : vector<8x128xf32>
    %25 = math.log %24 : vector<8x128xf32>
    %cst_12 = arith.constant 1.000000e+00 : f32
    %26 = vector.broadcast %cst_12 : f32 to vector<8x128xf32>
    %27 = arith.subf %26, %21 : vector<8x128xf32>
    %28 = arith.mulf %27, %27 : vector<8x128xf32>
    %cst_13 = arith.constant 1.000000e+00 : f32
    %29 = vector.broadcast %cst_13 : f32 to vector<8x128xf32>
    %30 = arith.subf %29, %15 : vector<8x128xf32>
    %31 = arith.mulf %28, %28 : vector<8x128xf32>
    %32 = arith.select %8, %30, %31 : vector<8x128xi1>, vector<8x128xf32>
    %33 = arith.mulf %25, %32 : vector<8x128xf32>
    %c2_i32 = arith.constant 2 : i32
    %34 = arith.muli %arg0, %c2_i32 : i32
    %35 = arith.addi %34, %arg1 : i32
    %c8_i32 = arith.constant 8 : i32
    %36 = arith.muli %35, %c8_i32 : i32
    %37 = tpu.iota {dimensions = array<i32: 0>} : vector<8x128xi32>
    %38 = vector.broadcast %36 : i32 to vector<8x128xi32>
    %39 = arith.addi %37, %38 : vector<8x128xi32>
    %c30_i32 = arith.constant 30 : i32
    %40 = vector.broadcast %c30_i32 : i32 to vector<8x128xi32>
    %41 = arith.cmpi slt, %39, %40 : vector<8x128xi32>
    %cst_14 = arith.constant 0.000000e+00 : f32
    %42 = vector.broadcast %cst_14 : f32 to vector<8x128xf32>
    %43 = arith.select %41, %33, %42 : vector<8x128xi1>, vector<8x128xf32>
    %cst_15 = arith.constant 0.000000e+00 : f32
    %44 = vector.broadcast %cst_15 : f32 to vector<8x128xf32>
    %45 = arith.select %41, %6, %44 : vector<8x128xi1>, vector<8x128xf32>
    %c0_16 = arith.constant 0 : index
    %c0_17 = arith.constant 0 : index
    %46 = vector.load %arg6[%c0_16, %c0_17] : memref<8x128xf32, #tpu.memory_space<vmem>>, vector<8x128xf32>
    %47 = vector.shape_cast %43 : vector<8x128xf32> to vector<1x8x128xf32>
    %cst_18 = arith.constant dense<0.000000e+00> : vector<8x128xf32>
    %48 = vector.multi_reduction <add>, %47, %cst_18 [0] : vector<1x8x128xf32> to vector<8x128xf32>
    %49 = arith.addf %46, %48 : vector<8x128xf32>
    %c0_19 = arith.constant 0 : index
    %c0_20 = arith.constant 0 : index
    %50 = vector.load %arg6[%c0_19, %c0_20] : memref<8x128xf32, #tpu.memory_space<vmem>>, vector<8x128xf32>
    tpu.vector_store %arg6[%c0_19, %c0_20], %49 {strides = array<i32>} : memref<8x128xf32, #tpu.memory_space<vmem>>, vector<8x128xf32>,
    %c0_21 = arith.constant 0 : index
    %c0_22 = arith.constant 0 : index
    %51 = vector.load %arg7[%c0_21, %c0_22] : memref<8x128xf32, #tpu.memory_space<vmem>>, vector<8x128xf32>
    %52 = vector.shape_cast %45 : vector<8x128xf32> to vector<1x8x128xf32>
    %cst_23 = arith.constant dense<0.000000e+00> : vector<8x128xf32>
    %53 = vector.multi_reduction <add>, %52, %cst_23 [0] : vector<1x8x128xf32> to vector<8x128xf32>
    %54 = arith.addf %51, %53 : vector<8x128xf32>
    %c0_24 = arith.constant 0 : index
    %c0_25 = arith.constant 0 : index
    %55 = vector.load %arg7[%c0_24, %c0_25] : memref<8x128xf32, #tpu.memory_space<vmem>>, vector<8x128xf32>
    tpu.vector_store %arg7[%c0_24, %c0_25], %54 {strides = array<i32>} : memref<8x128xf32, #tpu.memory_space<vmem>>, vector<8x128xf32>,
    %c1_i32 = arith.constant 1 : i32
    %56 = arith.cmpi eq, %arg1, %c1_i32 : i32
    %c0_i32_26 = arith.constant 0 : i32
    %57 = arith.cmpi eq, %arg2, %c0_i32_26 : i32
    %58 = arith.andi %56, %57 : i1
    %59 = arith.extui %58 : i1 to i32
    %c0_i32_27 = arith.constant 0 : i32
    %60 = arith.cmpi ne, %59, %c0_i32_27 : i32
    scf.if %60 {
      %c0_28 = arith.constant 0 : index
      %c0_29 = arith.constant 0 : index
      %61 = vector.load %arg6[%c0_28, %c0_29] : memref<8x128xf32, #tpu.memory_space<vmem>>, vector<8x128xf32>
      %62 = vector.shape_cast %61 : vector<8x128xf32> to vector<1x8x128xf32>
      %cst_30 = arith.constant dense<0.000000e+00> : vector<1xf32>
      %63 = vector.multi_reduction <add>, %62, %cst_30 [1, 2] : vector<1x8x128xf32> to vector<1xf32>
      %64 = vector.shape_cast %63 : vector<1xf32> to vector<1x1x1xf32>
      %65 = vector.extract %64[0, 0, 0] : f32 from vector<1x1x1xf32>
      %c0_31 = arith.constant 0 : index
      %c0_32 = arith.constant 0 : index
      %66 = vector.load %arg7[%c0_31, %c0_32] : memref<8x128xf32, #tpu.memory_space<vmem>>, vector<8x128xf32>
      %67 = vector.shape_cast %66 : vector<8x128xf32> to vector<1x8x128xf32>
      %cst_33 = arith.constant dense<0.000000e+00> : vector<1xf32>
      %68 = vector.multi_reduction <add>, %67, %cst_33 [1, 2] : vector<1x8x128xf32> to vector<1xf32>
      %69 = vector.shape_cast %68 : vector<1xf32> to vector<1x1x1xf32>
      %70 = vector.extract %69[0, 0, 0] : f32 from vector<1x1x1xf32>
      %71 = tpu.iota {dimensions = array<i32: 1>} : vector<8x128xi32>
      %c0_i32_34 = arith.constant 0 : i32
      %72 = vector.broadcast %c0_i32_34 : i32 to vector<8x128xi32>
      %73 = arith.cmpi eq, %71, %72 : vector<8x128xi32>
      %c1_i32_35 = arith.constant 1 : i32
      %74 = vector.broadcast %c1_i32_35 : i32 to vector<8x128xi32>
      %75 = arith.cmpi eq, %71, %74 : vector<8x128xi32>
      %cst_36 = arith.constant 0.000000e+00 : f32
      %76 = vector.broadcast %70 : f32 to vector<8x128xf32>
      %77 = vector.broadcast %cst_36 : f32 to vector<8x128xf32>
      %78 = arith.select %75, %76, %77 : vector<8x128xi1>, vector<8x128xf32>
      %79 = vector.broadcast %65 : f32 to vector<8x128xf32>
      %80 = arith.select %73, %79, %78 : vector<8x128xi1>, vector<8x128xf32>
      %81 = vector.shape_cast %80 : vector<8x128xf32> to vector<1x8x128xf32>
      %c0_37 = arith.constant 0 : index
      %c0_38 = arith.constant 0 : index
      %c0_39 = arith.constant 0 : index
      %82 = vector.load %arg5[%c0_37, %c0_38, %c0_39] : memref<1x8x128xf32, #tpu.memory_space<vmem>>, vector<1x8x128xf32>
      tpu.vector_store %arg5[%c0_37, %c0_38, %c0_39], %81 {strides = array<i32>} : memref<1x8x128xf32, #tpu.memory_space<vmem>>, vector<1x8x128xf32>,
    } else {
    }
    return
  }
  func.func @transform_0(%arg0: i32, %arg1: i32, %arg2: i32) -> (i32, i32) {
    %c2_i32 = arith.constant 2 : i32
    %0 = arith.muli %arg0, %c2_i32 : i32
    %1 = arith.addi %0, %arg1 : i32
    %c3_i32 = arith.constant 3 : i32
    %2 = arith.minsi %1, %c3_i32 : i32
    %c0_i32 = arith.constant 0 : i32
    return %2, %arg2 : i32, i32
  }
  func.func @transform_1(%arg0: i32, %arg1: i32, %arg2: i32) -> (i32, i32) {
    %c2_i32 = arith.constant 2 : i32
    %0 = arith.muli %arg0, %c2_i32 : i32
    %1 = arith.addi %0, %arg1 : i32
    %c3_i32 = arith.constant 3 : i32
    %2 = arith.minsi %1, %c3_i32 : i32
    %c0_i32 = arith.constant 0 : i32
    return %2, %arg2 : i32, i32
  }
  func.func @transform_2(%arg0: i32, %arg1: i32, %arg2: i32) -> (i32, i32, i32) {
    %c0_i32 = arith.constant 0 : i32
    %c0_i32_0 = arith.constant 0 : i32
    %c0_i32_1 = arith.constant 0 : i32
    return %arg0, %c0_i32, %c0_i32_0 : i32, i32, i32
  }
}

</mosaic_0001>

<bundles_post_ra>
// kernel: tpu_custom_call.1
= control target key start
LH: loop header
LB: loop body
LE: loop exit
PB: predicated region body
PF: predicated region fallthrough
CT: control target
= control target key end

     0   :  { %s1097_s0 = inlined_call_operand.hbm [shape: f32[30,128], index: 0, kind: input, shape index: {}]   ;;  %s1098_s1 = inlined_call_operand.hbm [shape: f32[30,128], index: 1, kind: input, shape index: {}]   ;;  %s1099_s2 = inlined_call_operand.hbm [shape: f32[2,8,128], index: 2, kind: output, shape index: {}]  }
   0x1   :  { %1106 = sst [smem:[#allocation15_spill]] %s1097_s0 }
   0x2   :  { %7 = vsyncpa [#allocation5], 0 }
   0x3   :  { %9 = vsyncpa [#allocation5 + $0x1], 0 }
   0x4   :  { %10 = vsyncpa [#allocation8], 0 }
   0x5   :  { %12 = vsyncpa [#allocation8 + $0x1], 0 }
   0x6   :  { %13 = vsyncpa [#allocation6], 0 }
   0x7   :  { %15 = vsyncpa [#allocation6 + $0x1], 0  ;;  %s806_s9 = smov 0   ;;  %s808_s10 = smov 0  }
   0x8   :  { %s810_s11 = smov 0   ;;  %s812_s12 = smov 0  }
   0x9   :  { %s814_s13 = smov 0   ;;  %s816_s14 = smov 0  }
   0xa   :  { %s818_s15 = smov 0   ;;  %s820_s16 = smov 0  }
   0xb   :  { %s822_s17 = smov 0   ;;  %s824_s18 = smov 0  }
   0xc   :  { %s826_s19 = smov 0  }
   0xd LB: > { %s455_s20 = sadd.s32 4294967295, %s785_s19   ;;  %s456_s21 = sadd.s32 4294967294, %s785_s19   ;;  %s785_s19 = sphi %s826_s19, %s21_s19   ;;  %s781_s18 = sphi %s824_s18, %s1135_s18   ;;  %s777_s17 = sphi %s822_s17, %s1134_s17   ;;  %s773_s16 = sphi %s820_s16, %s1133_s16   ;;  %s769_s15 = sphi %s818_s15, %s1132_s15   ;;  %s765_s14 = sphi %s816_s14, %s1131_s14   ;;  %s761_s13 = sphi %s814_s13, %s1130_s13   ;;  %s757_s12 = sphi %s812_s12, %s1129_s12   ;;  %s753_s11 = sphi %s810_s11, %s1128_s11   ;;  %s749_s10 = sphi %s808_s10, %s1127_s10   ;;  %s745_s9 = sphi %s806_s9, %s1126_s9  }
   0xe   : > { %s36_s22 = sadd.s32 1, %s777_s17  ;;  %s40_s23 = sadd.s32 1, %s781_s18 }
   0xf   : > { %p38_p0 = scmp.ge.s32.totalorder %s36_s22, 2  ;;  %s457_s24 = sshll.u32 %s781_s18, 1 }
  0x10   : > { %s45_s25 = sadd.s32 %s777_s17, %s457_s24  ;;  %s57_s26 = sadd.s32 1, %s765_s14 }
  0x11   : > { %s1137_s22 = smov (%p38_p0, %s36_s22), 0  ;;  %s1139_s23 = smov (!%p38_p0, %s40_s23), %s781_s18 }
  0x12   : > { %1107 = sst [smem:[#allocation13_spill]] %s1137_s22  ;;  %p46_p1 = scmp.lt.s32.totalorder %s45_s25, 3 }
  0x13   : > { %p64_p2 = scmp.ne.s32.totalorder %s765_s14, %s761_s13  ;;  %p42_p3 = scmp.ge.s32.totalorder %s1139_s23, 2 }
  0x14   : > { %p65_p4 = scmp.eq.s32.totalorder %s785_s19, 0  ;;  %s1141_s25 = smov (!%p46_p1, %s45_s25), 3 }
  0x15   : > { %s1143_s23 = smov (%p42_p3, %s1139_s23), 0  ;;  %p70_p6 = scmp.ne.s32.totalorder %s761_s13, %s757_s12 }
  0x16   : > { %1108 = sst [smem:[#allocation14_spill]] %s1143_s23  ;;  %p878_p5 = por %p65_p4, %p64_p2 }
  0x17   : > { %s458_s28 = sshll.u32 %s1143_s23, 1  ;;  %p71_p7 = scmp.eq.s32.totalorder %s455_s20, 0 }
  0x18   : > { %s49_s29 = sadd.s32 %s458_s28, %s1137_s22  ;;  %s116_s30 = ssub.s32 %s781_s18, %s1143_s23 }
  0x19   : > { %p50_p8 = scmp.lt.s32.totalorder %s49_s29, 3  ;;  %p890_p9 = por %p71_p7, %p70_p6 }
  0x1a   : > { %p117_p10 = scmp.eq.s32.totalorder %s116_s30, 0  ;;  %s119_s4 = sadd.s32 1, %s753_s11 }
  0x1b   : > { %s1110_s3 = scalar_select %p890_p9, 1, 0 }
  0x1c   : > { %s1145_s29 = smov (!%p50_p8, %s49_s29), 3  ;;  %p129_p11 = scmp.ne.s32.totalorder %s753_s11, %s749_s10 }
  0x1d   : > { %s896_s5 = scalar_select %p117_p10, %s753_s11, %s119_s4  }
  0x1e   : > { %s52_s6 = ssub.s32 %s1141_s25, %s1145_s29  ;;  %p130_p13 = scmp.eq.s32.totalorder %s455_s20, 3 }
  0x1f   : > { %p55_p12 = scmp.eq.s32.totalorder %s52_s6, 0  ;;  %p135_p0 = scmp.ne.s32.totalorder %s749_s10, %s745_s9 }
  0x20   : > { %p136_p1 = scmp.eq.s32.totalorder %s456_s21, 3  ;;  %p910_p2 = por %p130_p13, %p129_p11 }
  0x21   : > { %s908_s7 = scalar_select %p55_p12, %s765_s14, %s57_s26  }
  0x22   : > { %s1111_s8 = scalar_select %p910_p2, 1, 0 }
  0x23   : > { %p914_p3 = por %p136_p1, %p135_p0  ;;  %p504_p4 = scmp.lt.s32.totalorder %s785_s19, 4 }
  0x24   : > { %s920_s24 = sand.u32 1, %s765_s14   ;;  %s1101_s20 = sshll.u32 %s1141_s25, 7 }
  0x25   : > { %s1112_s12 = scalar_select %p914_p3, 1, 0 }
  0x26   : > { %s1100_s28 = sshll.u32 %s920_s24, 3  ;;  %s1113_s0 = sld [smem:[#allocation15_spill]] }
  0x27   : > { %s160_s30 = scalar_lea.vmem [#allocation4], %s1100_s28  ;;  %p935_p6 = pnand %p504_p4, %p878_p5 }
  0x28   : > { %s172_s4 = sshll.u32 %s160_s30, 4  ;;  %s157_s21 = scalar_lea.sflag [#allocation5], %s920_s24  ;;  %s939_s4 = int_to_ptr.vmem [resolvable:$true] %s172_s4 }
  0x29   : > { %p601_p11 = pneg %p935_p6 }
  0x2c   : > { %s929_s29 = scalar_lea.hbm %s1113_s0, %s1101_s20  ;;  %s604_s28 = scalar_lea.hbm %s1113_s0, 512 }
  0x2d   : > { %s599_s26 = scalar_lea.hbm %s929_s29, 128  ;;  %p605_p5 = scmp.lt.u32.totalorder %s929_s29, %s1113_s0 }
  0x2e   : > { %p600_p10 = scmp.ne.s32.totalorder %s929_s29, %s599_s26  ;;  %p606_p0 = scmp.lt.u32.totalorder %s604_s28, %s599_s26 }
  0x2f   : > { %p608_p4 = scmp.lt.u32.totalorder %s599_s26, %s929_s29 }
  0x30   : > { %p602_p12 = pnand %p601_p11, %p600_p10  ;;  %p607_p1 = por %p606_p0, %p605_p5 }
  0x32   : > { %p603_p13 = pneg %p602_p12  ;;  %p609_p7 = por %p608_p4, %p607_p1 }
  0x34   : > { %p610_p8 = pnand %p609_p7, %p603_p13 }
  0x36   : > { %613 = shalt.err (!%p610_p8)
}
  0x37   : > { %s614_s22 = scalar_lea.vmem %s939_s4, 128  ;;  %s787_s27 = smov [#allocation4]  }
  0x38   : > { %p615_p10 = scmp.ne.s32.totalorder %s939_s4, %s614_s22  ;;  %s619_s30 = sshll.u32 %s787_s27, 4  ;;  %s620_s30 = int_to_ptr.vmem [resolvable:$false] %s619_s30 }
  0x39   : > { %s621_s23 = scalar_lea.vmem %s620_s30, 256  ;;  %p622_p2 = scmp.lt.s32.totalorder %s939_s4, %s620_s30 }
  0x3a   : > { %p617_p12 = pnand %p615_p10, %p601_p11  ;;  %p623_p5 = scmp.lt.s32.totalorder %s621_s23, %s614_s22 }
  0x3c   : > { %p618_p3 = pneg %p617_p12  ;;  %p624_p0 = por %p623_p5, %p622_p2 }
  0x3e   : > { %p625_p1 = pnand %p624_p0, %p618_p3 }
  0x40   : > { %628 = shalt.err (!%p625_p1)
}
  0x41   : > { %496 = dma.hbm_to_vmem [thread:$0]  (!%p935_p6), %s929_s29, 128, %s939_s4, %s157_s21  }
  0x42   : > { %p1115_p7 = scmp.lt.s32.totalorder %s785_s19, 5  ;;  %p1116_p8 = scmp.ge.s32.totalorder %s785_s19, 1 }
  0x43   : > { %s1118_s22 = sshll.u32 %s1141_s25, 7  ;;  %s1119_s30 = sshll.u32 %s920_s24, 3 }
  0x44   : > { %p973_p13 = pnand %p1116_p8, %p1115_p7  ;;  %s982_s27 = scalar_lea.hbm %s1098_s1, %s1118_s22 }
  0x45   : > { %s183_s23 = scalar_lea.vmem [#allocation7], %s1119_s30  ;;  %s180_s29 = scalar_lea.sflag [#allocation8], %s920_s24 }
  0x46   : > { %s1117_s20 = scalar_select %p973_p13, 1, 0 }
  0x47   : > { %s195_s0 = sshll.u32 %s183_s23, 4  ;;  %s629_s4 = scalar_lea.hbm %s982_s27, 128  ;;  %s196_s0 = int_to_ptr.vmem [resolvable:$true] %s195_s0 }
  0x48   : > { %p630_p2 = scmp.ne.s32.totalorder %s982_s27, %s629_s4  ;;  %s634_s22 = scalar_lea.hbm %s1098_s1, 512 }
  0x49   : > { %p635_p10 = scmp.lt.u32.totalorder %s982_s27, %s1098_s1  ;;  %p636_p12 = scmp.lt.u32.totalorder %s634_s22, %s629_s4 }
  0x4a   : > { %p632_p3 = pnand %p630_p2, %p601_p11  ;;  %p638_p0 = scmp.lt.u32.totalorder %s629_s4, %s982_s27 }
  0x4b   : > { %p637_p5 = por %p636_p12, %p635_p10 }
  0x4c   : > { %p633_p4 = pneg %p632_p3 }
  0x4d   : > { %p639_p1 = por %p638_p0, %p637_p5 }
  0x4f   : > { %p640_p7 = pnand %p639_p1, %p633_p4 }
  0x51   : > { %643 = shalt.err (!%p640_p7)
}
  0x52   : > { %s644_s24 = scalar_lea.vmem %s196_s0, 128  ;;  %s788_s30 = smov [#allocation7]  }
  0x53   : > { %p645_p8 = scmp.ne.s32.totalorder %s196_s0, %s644_s24  ;;  %s649_s23 = sshll.u32 %s788_s30, 4  ;;  %s650_s23 = int_to_ptr.vmem [resolvable:$false] %s649_s23 }
  0x54   : > { %s651_s25 = scalar_lea.vmem %s650_s23, 256  ;;  %p652_p9 = scmp.lt.s32.totalorder %s196_s0, %s650_s23 }
  0x55   : > { %p647_p2 = pnand %p645_p8, %p601_p11  ;;  %p653_p13 = scmp.lt.s32.totalorder %s651_s25, %s644_s24 }
  0x57   : > { %p648_p3 = pneg %p647_p2  ;;  %p654_p10 = por %p653_p13, %p652_p9 }
  0x59   : > { %p655_p12 = pnand %p654_p10, %p648_p3 }
  0x5b   : > { %658 = shalt.err (!%p655_p12)
}
  0x5c   : > { %499 = dma.hbm_to_vmem [thread:$0]  (!%p935_p6), %s982_s27, 128, %s196_s0, %s180_s29  }
  0x5d   : > { %p1120_p4 = scmp.ne.s32.totalorder %s1117_s20, 0 }
  0x5e   : > { %s206_s4 = sand.u32 (!%p1120_p4), 1, %s761_s13   ;;  %p1121_p11 = scmp.ne.s32.totalorder (!%p1120_p4), %s1110_s3, 0 }
  0x5f   : > { %204 = sbr.rel (%p1120_p4) target bundleno = 404 (0x194), region = 28  ;;  %s470_s21 = sshll.u32 (!%p1120_p4), %s206_s4, 3 }
  0x60   : > { %s207_s22 = scalar_lea.sflag (!%p1120_p4), [#allocation5], %s206_s4  ;;  %s210_s28 = scalar_lea.vmem (!%p1120_p4), [#allocation4], %s470_s21 }
  0x66   : > { %732 = dma.done.wait (%p1121_p11), %s207_s22, 128  }
  0x67   : > { %734 = vsyncadd (%p1121_p11), %s207_s22, 4294967168  ;;  %s216_s26 = scalar_lea.sflag [#allocation8], %s206_s4  ;;  %s219_s24 = scalar_lea.vmem [#allocation7], %s470_s21 }
  0x68   : > { %736 = dma.done.wait (%p1121_p11), %s216_s26, 128  }
  0x69   : > { %738 = vsyncadd (%p1121_p11), %s216_s26, 4294967168  ;;  %s242_s0 = sand.u32 1, %s749_s10   ;;  %p253_p9 = scmp.eq.s32.totalorder %s769_s15, 0 }
  0x6a   : > { %s1021_s6 = sshll.u32 %s242_s0, 3  ;;  %v789_v0 = vmov (%p253_p9), 0.0  }
  0x6b   : > { %s244_s20 = scalar_lea.vmem [#allocation9], %s1021_s6  ;;  %258 = sbr.rel (!%p253_p9) target bundleno = 114 (0x72), region = 40  ;;  %259 = vst [vmem:[#allocation2] sm:$0xff] (%p253_p9), %v789_v0  ;;  %260 = vst [vmem:[#allocation3] sm:$0xff] (%p253_p9), %v789_v0 }
  0x72 PF: > { %v261_v1 = vld [vmem:[%s210_s28] sm:$0xff]  ;;  %s474_s3 = sshll.u32 %s773_s16, 1  ;;  %v283_v2 = vlaneseq  ;;  %p298_p6 = scmp.eq.s32.totalorder %s769_s15, 1  ;;  %v294_v7 = vld [vmem:[#allocation3] sm:$0xff]  ;;  %v290_v26 = vld [vmem:[#allocation2] sm:$0xff] }
  0x73   : > { %v264_v3 = vmul.f32 0.5, %v261_v1  ;;  %s281_s27 = sadd.s32 %s769_s15, %s474_s3  ;;  %v262_v8 = vld [vmem:[%s219_s24] sm:$0xff] }
  0x74   : > { %s475_s29 = sshll.u32 %s281_s27, 3  ;;  %v284_v4 = vshrl.u32 %v283_v2, 7  ;;  %vm263_vm1 = vcmp.gt.f32.partialorder %v262_v8, 0.0  ;;  %v324_v45 = vand.u32 (%p298_p6), 127, %v283_v2 }
  0x75   : > { %595 = vtanh.f32 %v264_v3  ;;  %v285_v5 = vstv %s475_s29 }
  0x76   : > { %v286_v6 = vadd.s32 %v285_v5, %v284_v4  ;;  %vm326_vm2 = vcmp.eq.s32.totalorder (%p298_p6), %v324_v45, 1  ;;  %vm325_vm3 = vcmp.eq.s32.totalorder (%p298_p6), %v324_v45, 0 }
  0x78   : > { %vm287_vm0 = vcmp.lt.s32.totalorder %v286_v6, 30 }
  0x79   : > { %v289_v9 = vsel %vm287_vm0, %v262_v8, 0.0 }
  0x7a   : > { %v296_v10 = vadd.f32 %v294_v7, %v289_v9 }
  0x7c   : > { %297 = vst [vmem:[#allocation3] sm:$0xff] %v296_v10 }
  0x7f   : > { %v596_v11 = vpop.eup %595 }
  0x80   : > { %v266_v12 = vadd.f32 1.0, %v596_v11 }
  0x82   : > { %v267_v13 = vmul.f32 0.5, %v266_v12 }
  0x83   : > { %v313_v30 = vld [vmem:[#allocation3] sm:$0xff] (%p298_p6) }
  0x84   : > { %v268_v14 = vsub.f32 1.0, %v267_v13 }
  0x86   : > { %v269_v15 = vadd.f32 0.05, %v268_v14 }
  0x88   : > { %v270_v16 = vmin.f32 %v269_v15, 1.0 }
  0x8a   : > { %v271_v17 = vsel %vm263_vm1, %v267_v13, %v270_v16  ;;  %v275_v19 = vsub.f32 1.0, %v270_v16 }
  0x8b   : > { %v272_v18 = vmax.f32 %v271_v17, 1e-08 }
  0x8c   : > { %v276_v20 = vmul.f32 %v275_v19, %v275_v19 }
  0x8d   : > { %597 = vlog2.f32 %v272_v18 }
  0x8e   : > { %v277_v21 = vmul.f32 %v276_v20, %v276_v20 }
  0x90   : > { %v278_v23 = vsel %vm263_vm1, %v268_v14, %v277_v21 }
  0x97   : > { %v598_v22 = vpop.eup %597 }
  0x98   : > { %v274_v24 = vmul.f32 0.6931472, %v598_v22 }
  0x99   : > { %302 = sbr.rel (!%p298_p6) target bundleno = 379 (0x17b), region = 44 }
  0x9a   : > { %v279_v25 = vmul.f32 %v278_v23, %v274_v24 }
  0x9c   : > { %v288_v27 = vsel %vm287_vm0, %v279_v25, 0.0 }
  0x9d   : > { %v292_v28 = vadd.f32 %v290_v26, %v288_v27 }
  0x9f   : > { %293 = vst [vmem:[#allocation2] sm:$0xff] %v292_v28 }
  0xa6   : > { %v303_v29 = vld [vmem:[#allocation2] sm:$0xff] }
  0xa7   : > { %304 = vadd.xlane.f32.xlu0 %v303_v29 }
  0xab   : > { %314 = vadd.xlane.f32.xlu0 %v313_v30 }
 0x134   : > { %v305_v31 = vpop.xlane.xlu0 %304 }
 0x135   : > { %v306_v32 = vrot.slane %v305_v31, 4 }
 0x137   : > { %v307_v33 = vadd.f32 %v306_v32, %v305_v31 }
 0x138   : > { %v315_v34 = vpop.xlane.xlu0 %314 }
 0x139   : > { %v308_v35 = vrot.slane %v307_v33, 2  ;;  %v316_v36 = vrot.slane %v315_v34, 4 }
 0x13b   : > { %v317_v37 = vadd.f32 %v316_v36, %v315_v34  ;;  %v309_v38 = vadd.f32 %v308_v35, %v307_v33 }
 0x13d   : > { %v318_v39 = vrot.slane %v317_v37, 2  ;;  %v310_v40 = vrot.slane %v309_v38, 1 }
 0x13f   : > { %v319_v41 = vadd.f32 %v318_v39, %v317_v37  ;;  %v311_v42 = vadd.f32 %v310_v40, %v309_v38 }
 0x141   : > { %483 = vpush %v311_v42  ;;  %v320_v43 = vrot.slane %v319_v41, 1 }
 0x143   : > { %v321_v44 = vadd.f32 %v320_v43, %v319_v41 }
 0x145   : > { %485 = vpush %v321_v44 }
 0x172   : > { %s484_s15 = spop %483 }
 0x173   : > { %v329_v47 = vstv %s484_s15 }
 0x176   : > { %s486_s30 = spop %485 }
 0x177   : > { %v327_v46 = vstv %s486_s30 }
 0x178   : > { %v328_v48 = vsel %vm326_vm2, %v327_v46, 0.0 }
 0x179   : > { %v330_v49 = vsel %vm325_vm3, %v329_v47, %v328_v48 }
 0x17a   : > { %331 = vst [vmem:[%s244_s20] sm:$0xff] %v330_v49 }
 0x17b PF: > { %s478_s23 = sshll.u32 %s773_s16, 7  ;;  %s346_s22 = sshll.u32 %s244_s20, 4  ;;  %s347_s22 = int_to_ptr.vmem [resolvable:$true] %s346_s22 }
 0x17c   : > { %s1037_s21 = scalar_lea.hbm %s1099_s2, %s478_s23  ;;  %s333_s28 = scalar_lea.sflag [#allocation6], %s242_s0 }
 0x17d   : > { %s659_s26 = scalar_lea.vmem %s347_s22, 128  ;;  %p1122_p5 = scmp.ne.s32.totalorder %s1111_s8, 0 }
 0x17e   : > { %p660_p13 = scmp.ne.s32.totalorder %s347_s22, %s659_s26  ;;  %s790_s24 = smov [#allocation9]  }
 0x17f   : > { %s663_s3 = sshll.u32 %s790_s24, 4  ;;  %s664_s3 = int_to_ptr.vmem [resolvable:$false] %s663_s3 }
 0x180   : > { %p661_p0 = pnand %p660_p13, %p1122_p5  ;;  %s665_s27 = scalar_lea.vmem %s664_s3, 256 }
 0x181   : > { %p666_p7 = scmp.lt.s32.totalorder %s347_s22, %s664_s3  ;;  %p667_p8 = scmp.lt.s32.totalorder %s665_s27, %s659_s26 }
 0x182   : > { %p662_p1 = pneg %p661_p0 }
 0x183   : > { %p668_p2 = por %p667_p8, %p666_p7 }
 0x185   : > { %p669_p3 = pnand %p668_p2, %p662_p1 }
 0x187   : > { %672 = shalt.err (!%p669_p3)
}
 0x188   : > { %s673_s16 = scalar_lea.hbm %s1037_s21, 128  ;;  %s677_s20 = scalar_lea.hbm %s1099_s2, 256 }
 0x189   : > { %p674_p10 = scmp.ne.s32.totalorder %s1037_s21, %s673_s16  ;;  %p678_p11 = scmp.lt.u32.totalorder %s1037_s21, %s1099_s2 }
 0x18a   : > { %p679_p9 = scmp.lt.u32.totalorder %s677_s20, %s673_s16  ;;  %p681_p13 = scmp.lt.u32.totalorder %s673_s16, %s1037_s21 }
 0x18b   : > { %p675_p12 = pnand %p674_p10, %p1122_p5 }
 0x18c   : > { %p680_p6 = por %p679_p9, %p678_p11 }
 0x18d   : > { %p676_p4 = pneg %p675_p12 }
 0x18e   : > { %p682_p0 = por %p681_p13, %p680_p6 }
 0x190   : > { %p683_p1 = pnand %p682_p0, %p676_p4 }
 0x192   : > { %686 = shalt.err (!%p683_p1)
}
 0x193   : > { %491 = dma.vmem_to_hbm [thread:$0]  (%p1122_p5), %s347_s22, 128, %s1037_s21, %s333_s28  }
 0x194 PF: > { %p505_p7 = scmp.ge.s32.totalorder %s785_s19, 2  ;;  %s358_s30 = sand.u32 1, %s745_s9  }
 0x195   : > { %p1123_p8 = scmp.ne.s32.totalorder %s1112_s12, 0  ;;  %s359_s23 = scalar_lea.sflag [#allocation6], %s358_s30 }
 0x197   : > { %p501_p2 = pnand %p505_p7, %p1123_p8 }
 0x199   : > { %740 = dma.done.wait (!%p501_p2), %s359_s23, 128  }
 0x19a   : > { %742 = vsyncadd (!%p501_p2), %s359_s23, 4294967168  ;;  %s21_s19 = sadd.s32 1, %s785_s19   ;;  %s1124_s8 = sld [smem:[#allocation13_spill]] }
 0x19b   : > { %p18_p3 = scmp.ge.s32.totalorder %s21_s19, 6   ;;  %s1125_s25 = sld [smem:[#allocation14_spill]] }
 0x19c   : > { %s1126_s9 = smov %s749_s10  ;;  %s1127_s10 = smov %s753_s11 }
 0x19d   : > { %s1128_s11 = smov %s896_s5  ;;  %s1129_s12 = smov %s761_s13 }
 0x19e   : > { %s1130_s13 = smov %s765_s14  ;;  %s1131_s14 = smov %s908_s7 }
 0x19f   : > { %s1132_s15 = smov %s777_s17  ;;  %s1133_s16 = smov %s781_s18 }
 0x1a0   : > { %s1134_s17 = smov %s1124_s8  ;;  %20 = sbr.rel (!%p18_p3) target bundleno = 13 (0xd), region = 94 }
 0x1a1   : > { %s1135_s18 = smov %s1125_s25 }
 0x1a7   :  { %364 = vsyncpa [#allocation5], 1 }
 0x1a8   :  { %366 = vsyncpa [#allocation5 + $0x1], 1 }
 0x1a9   :  { %367 = vsyncpa [#allocation8], 1 }
 0x1aa   :  { %369 = vsyncpa [#allocation8 + $0x1], 1 }
 0x1ab   :  { %370 = vsyncpa [#allocation6], 1 }
 0x1ac   :  { %372 = vsyncpa [#allocation6 + $0x1], 1 }

</bundles_post_ra>
